<compile_context>
chip_gen: v6e
topology: v6e:2x2x1
jax: 0.10.0
libtpu: 0.0.40
codegen_flags: <defaults>
</compile_context>

<pallas_src>
import jax
import jax.numpy as jnp
from jax.experimental import pallas as pl
from jax.experimental.pallas import tpu as pltpu


# <= v7x 64 MiB physical VMEM per TensorCore; comfortable headroom on v5e/v6e.
_VMEM_LIMIT_BYTES = 48 * 1024 * 1024


def _round_up(x, m):
    return (x + m - 1) // m * m


# ----------------------------- Pallas kernels --------------------------------

def _matmul_kernel(x_ref, w_ref, o_ref):
    """o tile = x tile @ w tile (full contraction dim resident in VMEM)."""
    o_ref[...] = jnp.dot(
        x_ref[...], w_ref[...],
        preferred_element_type=jnp.float32).astype(o_ref.dtype)


def _map_head_kernel(x_ref, wm_ref, wl_ref, o_ref, h_ref):
    """Fused (x @ Wm) @ Wl with the mapping result cached per row tile.

    Grid = (row tiles, vocab tiles); the vocab axis is innermost ("arbitrary").
    h = x @ Wm is computed once per row tile (at vocab step 0), stored as bf16
    in VMEM scratch and reused for every vocab tile (no per-step VPU cast).
    """
    @pl.when(pl.program_id(1) == 0)
    def _():
        h_ref[...] = jnp.dot(
            x_ref[...], wm_ref[...],
            preferred_element_type=jnp.float32).astype(h_ref.dtype)

    o_ref[...] = jnp.dot(
        h_ref[...], wl_ref[...],
        preferred_element_type=jnp.float32).astype(o_ref.dtype)


# ------------------------------ host wrappers ---------------------------------

def _tiled_matmul(x, w, tm, tn, out_dtype=jnp.float32):
    """out = x @ w for bf16 x:(Mp,K), w:(K,Np); K untiled (VMEM-resident).

    Both grid axes are "parallel" (megacore-friendly).  Grid order is chosen so
    the larger operand is streamed from HBM exactly once.
    """
    Mp, K = x.shape
    Np = w.shape[1]
    assert Mp % tm == 0 and Np % tn == 0
    nm, nn = Mp // tm, Np // tn
    out_bytes = Mp * Np * jnp.dtype(out_dtype).itemsize

    if nm * K * Np <= nn * Mp * K:
        # rows outer: w re-streamed nm times, x streamed once.
        grid = (nm, nn)
        x_map = lambda i, j: (i, 0)
        w_map = lambda i, j: (0, j)
        o_map = lambda i, j: (i, j)
        bytes_accessed = Mp * K * 2 + nm * K * Np * 2 + out_bytes
    else:
        # vocab outer: x re-streamed nn times, w streamed once.
        grid = (nn, nm)
        x_map = lambda j, i: (i, 0)
        w_map = lambda j, i: (0, j)
        o_map = lambda j, i: (i, j)
        bytes_accessed = nn * Mp * K * 2 + K * Np * 2 + out_bytes

    return pl.pallas_call(
        _matmul_kernel,
        out_shape=jax.ShapeDtypeStruct((Mp, Np), out_dtype),
        grid_spec=pltpu.PrefetchScalarGridSpec(
            num_scalar_prefetch=0,
            grid=grid,
            in_specs=[pl.BlockSpec((tm, K), x_map),
                      pl.BlockSpec((K, tn), w_map)],
            out_specs=pl.BlockSpec((tm, tn), o_map),
        ),
        compiler_params=pltpu.CompilerParams(
            dimension_semantics=("parallel", "parallel"),
            vmem_limit_bytes=_VMEM_LIMIT_BYTES),
        cost_estimate=pl.CostEstimate(
            flops=2 * Mp * K * Np, transcendentals=0,
            bytes_accessed=bytes_accessed),
    )(x, w)


def _fused_map_head(x, wm, wl, tm, tn):
    """(x @ wm) @ wl; bf16 in, f32 out; h cached per row tile in bf16 scratch."""
    Mp, H = x.shape
    Vp = wl.shape[1]
    nm, nn = Mp // tm, Vp // tn
    return pl.pallas_call(
        _map_head_kernel,
        out_shape=jax.ShapeDtypeStruct((Mp, Vp), jnp.float32),
        grid_spec=pltpu.PrefetchScalarGridSpec(
            num_scalar_prefetch=0,
            grid=(nm, nn),
            in_specs=[pl.BlockSpec((tm, H), lambda i, j: (i, 0)),   # x rows
                      pl.BlockSpec((H, H), lambda i, j: (0, 0)),    # mapping
                      pl.BlockSpec((H, tn), lambda i, j: (0, j))],  # head cols
            out_specs=pl.BlockSpec((tm, tn), lambda i, j: (i, j)),
            scratch_shapes=[pltpu.VMEM((tm, H), jnp.bfloat16)],     # cached h
        ),
        compiler_params=pltpu.CompilerParams(
            dimension_semantics=("parallel", "arbitrary"),
            vmem_limit_bytes=_VMEM_LIMIT_BYTES),
        cost_estimate=pl.CostEstimate(
            flops=2 * Mp * H * H + 2 * Mp * H * Vp, transcendentals=0,
            bytes_accessed=(Mp * H * 2 + H * H * 2 + nm * H * Vp * 2
                            + Mp * Vp * 4)),
    )(x, wm, wl)


def molr_logits(x, w_head_p, w_map=None, *, valid_v=None):
    """logits = (x @ w_map) @ w_head_p  (or x @ w_head_p if w_map is None).

    x:        (M, H) f32 activations (H a multiple of 128).
    w_head_p: (H, Vp) bf16 head weight, vocab already padded to the tile size.
    w_map:    optional (H, H) bf16 mapping weight.
    Returns (M, valid_v) f32 logits.
    """
    M, H = x.shape
    Vp = w_head_p.shape[1]
    valid_v = Vp if valid_v is None else valid_v

    # Vocab tile: lane-dense; 512 (full 2x256 MXU width on v6e/v7x) unless the
    # whole padded vocab is already <= 256.  No 384 fallback.
    tn = Vp if Vp <= 256 else 512
    assert Vp % tn == 0, "head weight must be pre-padded to the vocab tile"
    # Row tile: multiple of 16 (bf16 packs two rows per sublane); capped at 256
    # so the working set stays inside v7x's 64 MiB VMEM while amortizing the
    # ~0.35 us/grid-step overhead on v5e/v6e.
    tm = min(256, _round_up(M, 16))
    Mp = _round_up(M, tm)

    if Mp != M:
        x = jnp.pad(x, ((0, Mp - M), (0, 0)))
    xb = x.astype(jnp.bfloat16)

    if w_map is None:
        out = _tiled_matmul(xb, w_head_p, tm, tn)
    elif Mp // tm == 1:
        # Single row tile: compute h in a tiny separate kernel so the head
        # matmul can run with BOTH grid axes "parallel" -> both v7x TensorCores
        # stay busy across the vocab stream.  Extra h round-trip is tm*H bf16.
        hb = _tiled_matmul(xb, w_map, tm, H, out_dtype=jnp.bfloat16)
        out = _tiled_matmul(hb, w_head_p, tm, tn)
    else:
        out = _fused_map_head(xb, w_map, w_head_p, tm, tn)

    if Mp != M or Vp != valid_v:
        out = out[:M, :valid_v]
    return out


# --------------------------- Module (parameters) ------------------------------

class TripleMolrCausalLMPallas:
    """Deterministic re-implementation of TripleMolrCausalLM.forward."""

    def __init__(self, vocab_size=256, hidden_size=128, max_seq=128, seed=0):
        self.vocab_size = vocab_size
        self.hidden_size = hidden_size
        key = jax.random.PRNGKey(seed)
        ks = jax.random.split(key, 12)
        H, V = hidden_size, vocab_size
        s = 0.02
        # base-model proxy parameters (wte, wpe, final LN)
        self.wte = s * jax.random.normal(ks[0], (V, H), jnp.float32)
        self.wpe = s * jax.random.normal(ks[1], (max_seq, H), jnp.float32)
        self.ln_g = jnp.ones((H,), jnp.float32)
        self.ln_b = jnp.zeros((H,), jnp.float32)
        # mapping, mapping_1..mapping_5: nn.Linear(H, H, bias=False),
        # stored pre-transposed to (H_in, H_out).
        self.mapping = [s * jax.random.normal(ks[2 + i], (H, H), jnp.float32)
                        for i in range(6)]
        # lm_head, lm_head_1, lm_head_2: nn.Linear(H, V, bias=False),
        # stored pre-transposed to (H, V).
        self.lm_heads = [s * jax.random.normal(ks[8 + i], (H, V), jnp.float32)
                         for i in range(3)]

        # Hot-path weight copies: cast to bf16 and pad the vocab axis to the
        # tile multiple ONCE here (no per-forward HBM cast/pad pass).
        Vp128 = _round_up(V, 128)
        tn = Vp128 if Vp128 <= 256 else 512
        self._Vp = _round_up(V, tn)
        self.mapping_bf16 = [w.astype(jnp.bfloat16) for w in self.mapping]
        self.lm_heads_bf16 = [
            jnp.pad(w, ((0, 0), (0, self._Vp - V))).astype(jnp.bfloat16)
            for w in self.lm_heads]

    # --- base model proxy (plain-JAX glue) ---
    def base_model(self, input_ids):
        B, S = input_ids.shape
        h = self.wte[input_ids] + self.wpe[:S][None, :, :]
        mu = jnp.mean(h, axis=-1, keepdims=True)
        var = jnp.var(h, axis=-1, keepdims=True)
        h = (h - mu) * jax.lax.rsqrt(var + 1e-5) * self.ln_g + self.ln_b
        return h  # (B, S, H)

    # --- branch selection, matching the PyTorch forward on parameter_id ---
    def _select_indices(self, parameter_id):
        if parameter_id < 3:
            return None, parameter_id
        elif parameter_id < 5:
            return (2 if parameter_id == 3 else 1), 1
        elif parameter_id < 7:
            return (0 if parameter_id == 5 else 3), 0
        else:
            return (4 if parameter_id == 7 else 5), 2

    # --- forward (Pallas) ---
    def forward(self, input_ids, parameter_id):
        seq_out = self.base_model(input_ids)          # (B, S, H)
        B, S, H = seq_out.shape
        x = seq_out.reshape(B * S, H)
        map_idx, head_idx = self._select_indices(parameter_id)
        w_map = None if map_idx is None else self.mapping_bf16[map_idx]
        logits = molr_logits(x, self.lm_heads_bf16[head_idx], w_map,
                             valid_v=self.vocab_size)  # (B*S, V)
        return logits.reshape(B, S, self.vocab_size)

    # --- pure-JAX reference (same bf16-in / f32-accum numerics) ---
    def forward_ref(self, input_ids, parameter_id):
        seq_out = self.base_model(input_ids)
        B, S, H = seq_out.shape
        x = seq_out.reshape(B * S, H)
        map_idx, head_idx = self._select_indices(parameter_id)
        xb = x.astype(jnp.bfloat16)
        wlb = self.lm_heads[head_idx].astype(jnp.bfloat16)
        if map_idx is None:
            logits = jnp.dot(xb, wlb, preferred_element_type=jnp.float32)
        else:
            wmb = self.mapping[map_idx].astype(jnp.bfloat16)
            h = jnp.dot(xb, wmb, preferred_element_type=jnp.float32)
            logits = jnp.dot(h.astype(jnp.bfloat16), wlb,
                             preferred_element_type=jnp.float32)
        return logits.reshape(B, S, self.vocab_size)


# --------------------------------- main ----------------------------------------

if __name__ == "__main__":
    B, S, H, V = 2, 8, 128, 256
    model = TripleMolrCausalLMPallas(vocab_size=V, hidden_size=H,
                                     max_seq=128, seed=0)

    key = jax.random.PRNGKey(0)
    input_ids = jax.random.randint(key, (B, S), 0, V, dtype=jnp.int32)

    ok = True
    # All nine parameter_id branches at the module's nominal small shape.
    for parameter_id in range(9):
        out = jax.block_until_ready(model.forward(input_ids, parameter_id))
        ref = model.forward_ref(input_ids, parameter_id)
        ok &= out.shape == (B, S, V)
        ok &= bool(jnp.allclose(out, ref, atol=1e-2, rtol=1e-2))

    # Larger batch*seq (288 rows) exercises the multi-row-tile fused kernel,
    # the head-only multi-tile path, and row padding/slicing.
    B2, S2 = 3, 96
    ids2 = jax.random.randint(jax.random.PRNGKey(1), (B2, S2), 0, V,
                              dtype=jnp.int32)
    for parameter_id in (0, 5):
        out = jax.block_until_ready(model.forward(ids2, parameter_id))
        ref = model.forward_ref(ids2, parameter_id)
        ok &= out.shape == (B2, S2, V)
        ok &= bool(jnp.allclose(out, ref, atol=1e-2, rtol=1e-2))

    if ok:
        print("KERNEL_OK")
</pallas_src>

<mosaic_0001>
module attributes {stable_mosaic.version = 11 : i64} {
  func.func @_matmul_kernel(%arg0: i32, %arg1: i32, %arg2: memref<16x128xbf16, #tpu.memory_space<vmem>>, %arg3: memref<128x256xbf16, #tpu.memory_space<vmem>>, %arg4: memref<16x256xf32, #tpu.memory_space<vmem>>) attributes {dimension_semantics = [#tpu.dimension_semantics<parallel>, #tpu.dimension_semantics<parallel>], iteration_bounds = array<i64: 1, 1>, scalar_prefetch = 0 : i64, scratch_operands = 0 : i64, tpu.core_type = #tpu.core_type<tc>, window_params = [{transform_indices = @transform_0, window_bounds = array<i64: 16, 128>}, {transform_indices = @transform_1, window_bounds = array<i64: 128, 256>}, {transform_indices = @transform_2, window_bounds = array<i64: 16, 256>}]} {
    %c0 = arith.constant 0 : index
    %c0_0 = arith.constant 0 : index
    %0 = vector.load %arg2[%c0, %c0_0] : memref<16x128xbf16, #tpu.memory_space<vmem>>, vector<16x128xbf16>
    %c0_1 = arith.constant 0 : index
    %c0_2 = arith.constant 0 : index
    %1 = vector.load %arg3[%c0_1, %c0_2] : memref<128x256xbf16, #tpu.memory_space<vmem>>, vector<128x256xbf16>
    %cst = arith.constant dense<0.000000e+00> : vector<16x256xf32>
    %2 = tpu.matmul %0, %1, %cst {dimension_numbers = #tpu.dot_dimension_numbers<[1], [0], [0], [1], [0, 0, 1, 1], [], []>} : vector<16x128xbf16>, vector<128x256xbf16>, vector<16x256xf32> -> vector<16x256xf32>
    %c0_3 = arith.constant 0 : index
    %c0_4 = arith.constant 0 : index
    %3 = vector.load %arg4[%c0_3, %c0_4] : memref<16x256xf32, #tpu.memory_space<vmem>>, vector<16x256xf32>
    tpu.vector_store %arg4[%c0_3, %c0_4], %2 {strides = array<i32>} : memref<16x256xf32, #tpu.memory_space<vmem>>, vector<16x256xf32>,
    return
  }
  func.func @transform_0(%arg0: i32, %arg1: i32) -> (i32, i32) {
    %c0_i32 = arith.constant 0 : i32
    %c0_i32_0 = arith.constant 0 : i32
    return %arg1, %c0_i32 : i32, i32
  }
  func.func @transform_1(%arg0: i32, %arg1: i32) -> (i32, i32) {
    %c0_i32 = arith.constant 0 : i32
    %c0_i32_0 = arith.constant 0 : i32
    return %c0_i32, %arg0 : i32, i32
  }
  func.func @transform_2(%arg0: i32, %arg1: i32) -> (i32, i32) {
    %c0_i32 = arith.constant 0 : i32
    return %arg1, %arg0 : i32, i32
  }
}

</mosaic_0001>

<bundles_post_ra>
// kernel: tpu_custom_call.1
= control target key start
LH: loop header
LB: loop body
LE: loop exit
PB: predicated region body
PF: predicated region fallthrough
CT: control target
= control target key end

     0   :  { %7 = vsyncpa [#allocation3], 0  ;;  %s362_s0 = inlined_call_operand.hbm [shape: bf16[16,128], index: 0, kind: input, shape index: {}]   ;;  %s363_s1 = inlined_call_operand.hbm [shape: bf16[128,256], index: 1, kind: input, shape index: {}]   ;;  %s364_s2 = inlined_call_operand.hbm [shape: f32[16,256], index: 2, kind: output, shape index: {}]  }
   0x1   :  { %8 = vsyncpa [#allocation6], 0 }
   0x2   :  { %9 = vsyncpa [#allocation4], 0  ;;  %s328_s9 = smov [#allocation2]  }
   0x3   :  { %s15_s10 = sshll.u32 %s328_s9, 4  ;;  %s16_s10 = int_to_ptr.vmem [resolvable:$true] %s15_s10 }
   0x4   :  { %s270_s11 = scalar_lea.vmem %s16_s10, 128  ;;  %p275_p1 = scmp.lt.s32.totalorder %s16_s10, %s16_s10 }
   0x5   :  { %p271_p0 = scmp.ne.s32.totalorder %s16_s10, %s270_s11  ;;  %p276_p2 = scmp.lt.s32.totalorder %s270_s11, %s270_s11 }
   0x7   :  { %p277_p3 = por %p276_p2, %p275_p1 }
   0x9   :  { %p278_p4 = pnand %p277_p3, %p271_p0 }
   0xb   :  { %281 = shalt.err (!%p278_p4)
}
   0xc   :  { %s329_s12 = smov 64   ;;  %s330_s13 = smov 4  }
   0xd   :  { %21 = dma.hbm_to_vmem [thread:$0]  %s362_s0, 128, %s16_s10, [#allocation3], %s329_s12, %s329_s12, %s330_s13  }
   0xe   :  { %s331_s16 = smov [#allocation5]  }
   0xf   :  { %s27_s17 = sshll.u32 %s331_s16, 4  ;;  %s28_s17 = int_to_ptr.vmem [resolvable:$true] %s27_s17 }
  0x10   :  { %s290_s18 = scalar_lea.vmem %s28_s17, 2048  ;;  %p295_p6 = scmp.lt.s32.totalorder %s28_s17, %s28_s17 }
  0x11   :  { %p291_p5 = scmp.ne.s32.totalorder %s28_s17, %s290_s18  ;;  %p296_p7 = scmp.lt.s32.totalorder %s290_s18, %s290_s18 }
  0x13   :  { %p297_p8 = por %p296_p7, %p295_p6 }
  0x15   :  { %p298_p9 = pnand %p297_p8, %p291_p5 }
  0x17   :  { %301 = shalt.err (!%p298_p9)
}
  0x18   :  { %s332_s19 = smov 128   ;;  %s333_s20 = smov 8  }
  0x19   :  { %33 = dma.hbm_to_vmem [thread:$0]  %s363_s1, 2048, %s28_s17, [#allocation6], %s332_s19, %s332_s19, %s333_s20  }
  0x1a   :  { %322 = dma.done.wait [#allocation3], 128  }
  0x1b   :  { %323 = vsyncadd [#allocation3], 4294967168 }
  0x1c   :  { %324 = dma.done.wait [#allocation6], 2048  }
  0x1d   :  { %325 = vsyncadd [#allocation6], 4294965248  ;;  %v334_v0 = vmov 0   ;;  %v237_v1 = vld [vmem:[#allocation5 + $0x74] ss:$8 sps:$4 sm:$0xff]   ;;  %s335_s0 = smov [#allocation7]  }
  0x1e   :  { %177 = vmatprep.mubr.bf16.mxu0 %v334_v0  ;;  %v239_v2 = vld [vmem:[#allocation5 + $0x70] ss:$8 sps:$4 sm:$0xff]   ;;  %145 = vmatprep.subr.bf16.mxu0 %v237_v1  ;;  %v240_v3 = vld [vmem:[#allocation5 + $0x64] ss:$8 sps:$4 sm:$0xff]   ;;  %v242_v4 = vld [vmem:[#allocation5 + $0x60] ss:$8 sps:$4 sm:$0xff]  }
  0x1f   :  { %146 = vmatpush1.bf16.msra.mxu0 %v239_v2  ;;  %v243_v5 = vld [vmem:[#allocation5 + $0x54] ss:$8 sps:$4 sm:$0xff]   ;;  %v245_v6 = vld [vmem:[#allocation5 + $0x50] ss:$8 sps:$4 sm:$0xff]   ;;  %v246_v7 = vld [vmem:[#allocation5 + $0x44] ss:$8 sps:$4 sm:$0xff]  }
  0x20   :  { %147 = vmatprep.subr.bf16.mxu0 %v240_v3  ;;  %v248_v8 = vld [vmem:[#allocation5 + $0x40] ss:$8 sps:$4 sm:$0xff]   ;;  %v249_v9 = vld [vmem:[#allocation5 + $0x34] ss:$8 sps:$4 sm:$0xff]   ;;  %v251_v10 = vld [vmem:[#allocation5 + $0x30] ss:$8 sps:$4 sm:$0xff]  }
  0x21   :  { %v252_v11 = vld [vmem:[#allocation5 + $0x24] ss:$8 sps:$4 sm:$0xff]   ;;  %v254_v12 = vld [vmem:[#allocation5 + $0x20] ss:$8 sps:$4 sm:$0xff]   ;;  %v255_v13 = vld [vmem:[#allocation5 + $0x14] ss:$8 sps:$4 sm:$0xff]  }
  0x22   :  { %v257_v14 = vld [vmem:[#allocation5 + $0x10] ss:$8 sps:$4 sm:$0xff]   ;;  %v258_v15 = vld [vmem:[#allocation5 + $0x4] ss:$8 sps:$4 sm:$0xff]   ;;  %v260_v16 = vld [vmem:[#allocation5] ss:$8 sps:$4 sm:$0xff]  }
  0x23   :  { %148 = vmatpush1.bf16.msra.mxu0 %v242_v4  ;;  %v261_v17 = vld [vmem:[#allocation2] sm:$0xff]   ;;  %s197_s1 = sshll.u32 %s335_s0, 4  ;;  %s198_s1 = int_to_ptr.vmem [resolvable:$true] %s197_s1 }
  0x24   :  { %149 = vmatprep.subr.bf16.mxu0 %v243_v5  ;;  %s302_s23 = scalar_lea.vmem %s198_s1, 512  ;;  %p307_p11 = scmp.lt.s32.totalorder %s198_s1, %s198_s1 }
  0x25   :  { %p303_p10 = scmp.ne.s32.totalorder %s198_s1, %s302_s23  ;;  %p308_p12 = scmp.lt.s32.totalorder %s302_s23, %s302_s23 }
  0x27   :  { %150 = vmatpush1.bf16.msra.mxu0 %v245_v6  ;;  %p309_p13 = por %p308_p12, %p307_p11 }
  0x28   :  { %151 = vmatprep.subr.bf16.mxu0 %v246_v7 }
  0x29   :  { %p310_p0 = pnand %p309_p13, %p303_p10 }
  0x2b   :  { %152 = vmatpush1.bf16.msra.mxu0 %v248_v8 }
  0x2c   :  { %153 = vmatprep.subr.bf16.mxu0 %v249_v9 }
  0x2f   :  { %154 = vmatpush1.bf16.msra.mxu0 %v251_v10 }
  0x30   :  { %155 = vmatprep.subr.bf16.mxu0 %v252_v11 }
  0x33   :  { %156 = vmatpush1.bf16.msra.mxu0 %v254_v12 }
  0x34   :  { %157 = vmatprep.subr.bf16.mxu0 %v255_v13 }
  0x37   :  { %158 = vmatpush1.bf16.msra.mxu0 %v257_v14 }
  0x38   :  { %159 = vmatprep.subr.bf16.mxu0 %v258_v15 }
  0x3b   :  { %160 = vmatpush1.bf16.msra.mxu0 %v260_v16 }
  0x3e   :  { %178 = vmatmul.mubr.bf16.vlgmr.msra.gmra.mxu0 %v261_v17 }
  0xfe   :  { %v179_v18 = vpop.f32.mrf.mxu0 }
  0xff   :  { %188 = vst [vmem:[#allocation7] sm:$0xff] %v179_v18 }
 0x100   :  { %v181_v19 = vpop.f32.mrf.mxu0 }
 0x101   :  { %189 = vst [vmem:[#allocation7 + $0x8] sm:$0xff] %v181_v19 }
 0x102   :  { %v183_v20 = vpop.f32.mrf.mxu0 }
 0x103   :  { %190 = vst [vmem:[#allocation7 + $0x10] sm:$0xff] %v183_v20 }
 0x104   :  { %v185_v21 = vpop.f32.mrf.mxu0 }
 0x105   :  { %191 = vst [vmem:[#allocation7 + $0x18] sm:$0xff] %v185_v21 }
 0x106   :  { %313 = shalt.err (!%p310_p0)
}
 0x107   :  { %s336_s24 = smov 256   ;;  %s337_s25 = smov 16  }
 0x108   :  { %203 = dma.vmem_to_hbm [thread:$0]  %s198_s1, 512, %s364_s2, [#allocation4], %s336_s24, %s336_s24, %s337_s25  }
 0x109   :  { %326 = dma.done.wait [#allocation4], 512  }
 0x10a   :  { %327 = vsyncadd [#allocation4], 4294966784 }
 0x10b   :  { %207 = vsyncpa [#allocation3], 1 }
 0x10c   :  { %208 = vsyncpa [#allocation6], 1 }
 0x10d   :  { %209 = vsyncpa [#allocation4], 1 }

</bundles_post_ra>
